<compile_context>
chip_gen: v7x
topology: tpu7x:2x2x1
jax: 0.10.0
libtpu: 0.0.40
codegen_flags: <defaults>
</compile_context>

<pallas_src>
import functools

import jax
import jax.numpy as jnp
from jax.experimental import pallas as pl
from jax.experimental.pallas import tpu as pltpu


def _basic_block_kernel(x_ref, w1_ref, w2_ref, b1_ref, b2_ref, out_ref,
                        stk_ref, *, L):
    # x_ref   : (C, T)   activation slab, batch folded into lanes (T | N*L)
    # w1_ref  : (P, 3C)  conv1 taps (BN1 scale folded), order [l-1 | l | l+1]
    # w2_ref  : (P, 3P)  conv2 taps (BN2 scale folded)
    # b1_ref  : (P, 1)   folded BN1 bias (f32)
    # b2_ref  : (P, 1)   folded BN2 bias (f32)
    # out_ref : (P, T)   f32
    # stk_ref : VMEM (3C, T) im2col operand scratch (op dtype)
    C, T = x_ref.shape
    op_dtype = x_ref.dtype

    # Position inside each batch element (tiles always start on a batch
    # boundary because T is a multiple of L and T divides N*L).
    pos = jax.lax.broadcasted_iota(jnp.int32, (1, T), 1) % L
    has_left = pos != 0          # x[l-1] exists within this batch element
    has_right = pos != (L - 1)   # x[l+1] exists within this batch element
    zero = jnp.zeros((), op_dtype)

    def conv3(a, w_ref):
        # Build the (3C, T) im2col operand [a_{l-1}; a_l; a_{l+1}] directly in
        # the VMEM scratch (lane shifts on the XLU via roll; halo columns —
        # including roll wrap-around — killed by a true select), then one MXU
        # matmul with the tap-stacked, BN-scale-folded weights.
        stk_ref[0:C, :] = jnp.where(has_left, pltpu.roll(a, 1, axis=1), zero)
        stk_ref[C:2 * C, :] = a
        # roll by T-1 == roll by -1; wrap lands on pos == L-1 and is masked.
        stk_ref[2 * C:3 * C, :] = jnp.where(
            has_right, pltpu.roll(a, T - 1, axis=1), zero)
        return jnp.dot(w_ref[...], stk_ref[...],
                       preferred_element_type=jnp.float32)        # (P, T) f32

    x = x_ref[...]                                                # (C, T)
    # conv1 -> bn1 (scale folded into w1, bias here) -> relu1
    h = jnp.maximum(conv3(x, w1_ref) + b1_ref[...], 0.0)
    # conv2 -> bn2 -> + residual -> relu2
    y = conv3(h.astype(op_dtype), w2_ref) + b2_ref[...] + x.astype(jnp.float32)
    out_ref[...] = jnp.maximum(y, 0.0).astype(out_ref.dtype)


def _pick_lane_tile(N, L, C, P, op_bytes):
    """Lane tile T: multiple of L (per-batch halos stay in-tile), multiple of
    128 (unmasked lane-dense stores), per-step working set <= ~10 MiB, and
    >= 2 grid steps when possible (v7x megacore / DMA-compute overlap)."""
    # Rough per-lane VMEM bytes: double-buffered in/out slabs + (3C,T) im2col
    # scratch + in-kernel f32 temporaries.
    per_lane = C * (5 * op_bytes + 12) + 16 * P
    cap = max((10 * 1024 * 1024) // max(per_lane, 1), 128)
    cands = [d * L for d in range(1, N + 1)
             if N % d == 0 and (d * L) % 128 == 0 and d * L <= cap]
    if cands:
        multi = [t for t in cands if t < N * L]   # keep >= 2 grid steps
        return max(multi) if multi else max(cands)
    # TODO(synk): support lane tiles that are multiples of L but not of 128
    # (masked stores) for ragged L instead of falling back to one big tile.
    if L % 128 == 0:
        return L
    return N * L


def basic_block(x, w1, w2, bn1, bn2, eps=1e-5):
    """x: (N, C, L) float32.  w1: (P, C, 3), w2: (P, P, 3).
    bn1/bn2: dicts with gamma, beta, mean, var of shape (P,)."""
    N, C, L = x.shape
    P = w1.shape[0]
    assert C == P, "stride=1, downsample=None path requires inplanes == planes"
    f32 = jnp.float32

    # bf16 MXU matmuls when the im2col slice stores stay sublane-aligned for
    # packed bf16; tiny / odd channel counts keep f32.
    # TODO(synk): for tiny C (like the 8-channel demo) a pure-VPU
    # broadcast-mul-add conv would beat the MXU path; not implemented.
    op_dtype = jnp.bfloat16 if C % 16 == 0 else f32
    ob = jnp.dtype(op_dtype).itemsize

    # ---- fold BN (eval mode) into the conv weights; keep only the bias ----
    s1 = bn1["gamma"].astype(f32) / jnp.sqrt(bn1["var"].astype(f32) + eps)
    s2 = bn2["gamma"].astype(f32) / jnp.sqrt(bn2["var"].astype(f32) + eps)
    b1 = (bn1["beta"].astype(f32) - bn1["mean"].astype(f32) * s1).reshape(P, 1)
    b2 = (bn2["beta"].astype(f32) - bn2["mean"].astype(f32) * s2).reshape(P, 1)

    def fold_w(w, s):
        # (P, Cin, 3) * per-output-channel scale -> (P, 3*Cin); taps stacked
        # along the contraction axis in the order [x_{l-1} | x_l | x_{l+1}].
        w = w.astype(f32) * s[:, None, None]
        return jnp.concatenate([w[:, :, 0], w[:, :, 1], w[:, :, 2]],
                               axis=1).astype(op_dtype)

    w1s = fold_w(w1, s1)                 # (P, 3C)
    w2s = fold_w(w2, s2)                 # (P, 3P)

    # ---- lane-dense layout: fold batch into the lane (fast) axis ----
    NL = N * L
    xt = jnp.transpose(x, (1, 0, 2)).reshape(C, NL).astype(op_dtype)  # (C, NL)

    T = _pick_lane_tile(N, L, C, P, ob)
    grid = (NL // T,)

    kernel = functools.partial(_basic_block_kernel, L=L)

    grid_spec = pltpu.PrefetchScalarGridSpec(
        num_scalar_prefetch=0,
        grid=grid,
        in_specs=[
            pl.BlockSpec((C, T), lambda i: (0, i)),        # activation slab
            pl.BlockSpec((P, 3 * C), lambda i: (0, 0)),    # folded conv1 taps
            pl.BlockSpec((P, 3 * P), lambda i: (0, 0)),    # folded conv2 taps
            pl.BlockSpec((P, 1), lambda i: (0, 0)),        # bn1 bias
            pl.BlockSpec((P, 1), lambda i: (0, 0)),        # bn2 bias
        ],
        out_specs=pl.BlockSpec((P, T), lambda i: (0, i)),
        scratch_shapes=[pltpu.VMEM((3 * C, T), op_dtype)],  # im2col operand
    )

    flops = int(12 * P * C * NL + 6 * P * NL)
    bytes_accessed = int(ob * (C * NL + P * 3 * C + P * 3 * P)
                         + 4 * (P * NL + 2 * P))

    out_flat = pl.pallas_call(
        kernel,
        out_shape=jax.ShapeDtypeStruct((P, NL), f32),
        grid_spec=grid_spec,
        compiler_params=pltpu.CompilerParams(
            dimension_semantics=("parallel",),
            vmem_limit_bytes=32 * 1024 * 1024),
        cost_estimate=pl.CostEstimate(flops=flops, transcendentals=0,
                                      bytes_accessed=bytes_accessed),
    )(xt, w1s, w2s, b1, b2)

    # back to PyTorch NCL layout
    return out_flat.reshape(P, N, L).transpose(1, 0, 2)


def _reference(x, w1, w2, bn1, bn2, eps=1e-5):
    """Pure-JAX reference mirroring the PyTorch eval-mode forward."""
    def conv1d_3(inp, w):
        return jax.lax.conv_general_dilated(
            inp, w, window_strides=(1,), padding=((1, 1),),
            dimension_numbers=("NCH", "OIH", "NCH"))

    def bn(inp, p):
        scale = p["gamma"] / jnp.sqrt(p["var"] + eps)
        bias = p["beta"] - p["mean"] * scale
        return inp * scale[None, :, None] + bias[None, :, None]

    out = jax.nn.relu(bn(conv1d_3(x, w1), bn1))
    out = bn(conv1d_3(out, w2), bn2)
    out = out + x
    return jax.nn.relu(out)


if __name__ == "__main__":
    def make_inputs(key, N, C, L, wscale):
        P = C
        keys = jax.random.split(key, 8)
        x = jax.random.normal(keys[0], (N, C, L), dtype=jnp.float32)
        w1 = jax.random.normal(keys[1], (P, C, 3), dtype=jnp.float32) * wscale
        w2 = jax.random.normal(keys[2], (P, P, 3), dtype=jnp.float32) * wscale
        bn1 = dict(gamma=1.0 + 0.1 * jax.random.normal(keys[3], (P,)),
                   beta=0.1 * jax.random.normal(keys[4], (P,)),
                   mean=0.05 * jax.random.normal(keys[5], (P,)),
                   var=jnp.abs(1.0 + 0.1 * jax.random.normal(keys[6], (P,))))
        bn2 = dict(gamma=1.0 + 0.1 * jax.random.normal(keys[7], (P,)),
                   beta=jnp.zeros((P,), jnp.float32),
                   mean=jnp.zeros((P,), jnp.float32),
                   var=jnp.ones((P,), jnp.float32))
        return x, w1, w2, bn1, bn2

    key = jax.random.PRNGKey(0)
    k1, k2 = jax.random.split(key)

    # Config A: tiny channels -> f32 path, single 128-lane tile.
    args_a = make_inputs(k1, N=4, C=8, L=32, wscale=0.2)
    out_a = jax.block_until_ready(basic_block(*args_a))
    ref_a = _reference(*args_a)
    assert out_a.shape == ref_a.shape
    assert jnp.allclose(out_a, ref_a, atol=1e-4, rtol=1e-4), \
        float(jnp.max(jnp.abs(out_a - ref_a)))

    # Config B: C % 16 == 0 -> bf16 MXU path, 2-step grid (T = 128 lanes).
    args_b = make_inputs(k2, N=4, C=32, L=64, wscale=0.1)
    out_b = jax.block_until_ready(basic_block(*args_b))
    ref_b = _reference(*args_b)
    assert out_b.shape == ref_b.shape
    assert jnp.allclose(out_b, ref_b, atol=5e-2, rtol=5e-2), \
        float(jnp.max(jnp.abs(out_b - ref_b)))

    print("KERNEL_OK")
</pallas_src>

<mosaic_0001>
module attributes {stable_mosaic.version = 11 : i64} {
  func.func @_basic_block_kernel(%arg0: i32, %arg1: memref<8x128xf32, #tpu.memory_space<vmem>>, %arg2: memref<8x24xf32, #tpu.memory_space<vmem>>, %arg3: memref<8x24xf32, #tpu.memory_space<vmem>>, %arg4: memref<8x1xf32, #tpu.memory_space<vmem>>, %arg5: memref<8x1xf32, #tpu.memory_space<vmem>>, %arg6: memref<8x128xf32, #tpu.memory_space<vmem>>, %arg7: memref<24x128xf32, #tpu.memory_space<vmem>>) attributes {dimension_semantics = [#tpu.dimension_semantics<parallel>], iteration_bounds = array<i64: 1>, scalar_prefetch = 0 : i64, scratch_operands = 1 : i64, tpu.core_type = #tpu.core_type<tc>, window_params = [{transform_indices = @transform_0, window_bounds = array<i64: 8, 128>}, {pipeline_mode = #tpu.pipeline_mode<synchronous>, transform_indices = @transform_1, window_bounds = array<i64: 8, 24>}, {pipeline_mode = #tpu.pipeline_mode<synchronous>, transform_indices = @transform_2, window_bounds = array<i64: 8, 24>}, {pipeline_mode = #tpu.pipeline_mode<synchronous>, transform_indices = @transform_3, window_bounds = array<i64: 8, 1>}, {pipeline_mode = #tpu.pipeline_mode<synchronous>, transform_indices = @transform_4, window_bounds = array<i64: 8, 1>}, {transform_indices = @transform_5, window_bounds = array<i64: 8, 128>}]} {
    %0 = tpu.iota {dimensions = array<i32: 1>} : vector<1x128xi32>
    %c32_i32 = arith.constant 32 : i32
    %c0_i32 = arith.constant 0 : i32
    %1 = arith.cmpi eq, %c32_i32, %c0_i32 : i32
    %c1_i32 = arith.constant 1 : i32
    %2 = arith.select %1, %c1_i32, %c32_i32 : i32
    %3 = vector.broadcast %2 : i32 to vector<1x128xi32>
    %4 = arith.remsi %0, %3 : vector<1x128xi32>
    %c0_i32_0 = arith.constant 0 : i32
    %5 = vector.broadcast %c0_i32_0 : i32 to vector<1x128xi32>
    %6 = arith.cmpi ne, %4, %5 : vector<1x128xi32>
    %c0_i32_1 = arith.constant 0 : i32
    %7 = vector.broadcast %c0_i32_1 : i32 to vector<1x128xi32>
    %8 = arith.cmpi slt, %4, %7 : vector<1x128xi32>
    %c0_i32_2 = arith.constant 0 : i32
    %9 = arith.cmpi slt, %2, %c0_i32_2 : i32
    %10 = vector.broadcast %9 : i1 to vector<1x128xi1>
    %11 = vector.broadcast %10 : vector<1x128xi1> to vector<1x128xi1>
    %12 = arith.xori %8, %11 : vector<1x128xi1>
    %13 = arith.andi %12, %6 : vector<1x128xi1>
    %14 = vector.broadcast %2 : i32 to vector<1x128xi32>
    %15 = arith.addi %4, %14 : vector<1x128xi32>
    %16 = arith.select %13, %15, %4 : vector<1x128xi1>, vector<1x128xi32>
    %c0_i32_3 = arith.constant 0 : i32
    %17 = vector.broadcast %c0_i32_3 : i32 to vector<1x128xi32>
    %18 = arith.cmpi ne, %16, %17 : vector<1x128xi32>
    %c31_i32 = arith.constant 31 : i32
    %19 = vector.broadcast %c31_i32 : i32 to vector<1x128xi32>
    %20 = arith.cmpi ne, %16, %19 : vector<1x128xi32>
    %c0 = arith.constant 0 : index
    %c0_4 = arith.constant 0 : index
    %21 = vector.load %arg1[%c0, %c0_4] : memref<8x128xf32, #tpu.memory_space<vmem>>, vector<8x128xf32>
    %c1_i32_5 = arith.constant 1 : i32
    %22 = tpu.dynamic_rotate %21 by %c1_i32_5 dim 1 : vector<8x128xf32>, i32 -> vector<8x128xf32>
    %cst = arith.constant 0.000000e+00 : f32
    %23 = vector.shape_cast %18 : vector<1x128xi1> to vector<1x128xi1>
    %24 = vector.broadcast %23 : vector<1x128xi1> to vector<8x128xi1>
    %25 = vector.broadcast %cst : f32 to vector<8x128xf32>
    %26 = arith.select %24, %22, %25 : vector<8x128xi1>, vector<8x128xf32>
    %c0_6 = arith.constant 0 : index
    %c0_7 = arith.constant 0 : index
    %27 = vector.load %arg7[%c0_6, %c0_7] : memref<24x128xf32, #tpu.memory_space<vmem>>, vector<8x128xf32>
    tpu.vector_store %arg7[%c0_6, %c0_7], %26 {strides = array<i32>} : memref<24x128xf32, #tpu.memory_space<vmem>>, vector<8x128xf32>,
    %c8 = arith.constant 8 : index
    %c0_8 = arith.constant 0 : index
    %28 = vector.load %arg7[%c8, %c0_8] : memref<24x128xf32, #tpu.memory_space<vmem>>, vector<8x128xf32>
    tpu.vector_store %arg7[%c8, %c0_8], %21 {strides = array<i32>} : memref<24x128xf32, #tpu.memory_space<vmem>>, vector<8x128xf32>,
    %c127_i32 = arith.constant 127 : i32
    %29 = tpu.dynamic_rotate %21 by %c127_i32 dim 1 : vector<8x128xf32>, i32 -> vector<8x128xf32>
    %cst_9 = arith.constant 0.000000e+00 : f32
    %30 = vector.shape_cast %20 : vector<1x128xi1> to vector<1x128xi1>
    %31 = vector.broadcast %30 : vector<1x128xi1> to vector<8x128xi1>
    %32 = vector.broadcast %cst_9 : f32 to vector<8x128xf32>
    %33 = arith.select %31, %29, %32 : vector<8x128xi1>, vector<8x128xf32>
    %c16 = arith.constant 16 : index
    %c0_10 = arith.constant 0 : index
    %34 = vector.load %arg7[%c16, %c0_10] : memref<24x128xf32, #tpu.memory_space<vmem>>, vector<8x128xf32>
    tpu.vector_store %arg7[%c16, %c0_10], %33 {strides = array<i32>} : memref<24x128xf32, #tpu.memory_space<vmem>>, vector<8x128xf32>,
    %c0_11 = arith.constant 0 : index
    %c0_12 = arith.constant 0 : index
    %35 = vector.load %arg2[%c0_11, %c0_12] : memref<8x24xf32, #tpu.memory_space<vmem>>, vector<8x24xf32>
    %c0_13 = arith.constant 0 : index
    %c0_14 = arith.constant 0 : index
    %36 = vector.load %arg7[%c0_13, %c0_14] : memref<24x128xf32, #tpu.memory_space<vmem>>, vector<24x128xf32>
    %cst_15 = arith.constant dense<0.000000e+00> : vector<8x128xf32>
    %37 = tpu.matmul %35, %36, %cst_15 {dimension_numbers = #tpu.dot_dimension_numbers<[1], [0], [0], [1], [0, 0, 1, 1], [], []>} : vector<8x24xf32>, vector<24x128xf32>, vector<8x128xf32> -> vector<8x128xf32>
    %c0_16 = arith.constant 0 : index
    %c0_17 = arith.constant 0 : index
    %38 = vector.load %arg4[%c0_16, %c0_17] : memref<8x1xf32, #tpu.memory_space<vmem>>, vector<8x1xf32>
    %39 = vector.broadcast %38 : vector<8x1xf32> to vector<8x128xf32>
    %40 = arith.addf %37, %39 : vector<8x128xf32>
    %cst_18 = arith.constant 0.000000e+00 : f32
    %41 = vector.broadcast %cst_18 : f32 to vector<8x128xf32>
    %42 = arith.maximumf %40, %41 : vector<8x128xf32>
    %c1_i32_19 = arith.constant 1 : i32
    %43 = tpu.dynamic_rotate %42 by %c1_i32_19 dim 1 : vector<8x128xf32>, i32 -> vector<8x128xf32>
    %cst_20 = arith.constant 0.000000e+00 : f32
    %44 = vector.shape_cast %18 : vector<1x128xi1> to vector<1x128xi1>
    %45 = vector.broadcast %44 : vector<1x128xi1> to vector<8x128xi1>
    %46 = vector.broadcast %cst_20 : f32 to vector<8x128xf32>
    %47 = arith.select %45, %43, %46 : vector<8x128xi1>, vector<8x128xf32>
    %c0_21 = arith.constant 0 : index
    %c0_22 = arith.constant 0 : index
    %48 = vector.load %arg7[%c0_21, %c0_22] : memref<24x128xf32, #tpu.memory_space<vmem>>, vector<8x128xf32>
    tpu.vector_store %arg7[%c0_21, %c0_22], %47 {strides = array<i32>} : memref<24x128xf32, #tpu.memory_space<vmem>>, vector<8x128xf32>,
    %c8_23 = arith.constant 8 : index
    %c0_24 = arith.constant 0 : index
    %49 = vector.load %arg7[%c8_23, %c0_24] : memref<24x128xf32, #tpu.memory_space<vmem>>, vector<8x128xf32>
    tpu.vector_store %arg7[%c8_23, %c0_24], %42 {strides = array<i32>} : memref<24x128xf32, #tpu.memory_space<vmem>>, vector<8x128xf32>,
    %c127_i32_25 = arith.constant 127 : i32
    %50 = tpu.dynamic_rotate %42 by %c127_i32_25 dim 1 : vector<8x128xf32>, i32 -> vector<8x128xf32>
    %cst_26 = arith.constant 0.000000e+00 : f32
    %51 = vector.shape_cast %20 : vector<1x128xi1> to vector<1x128xi1>
    %52 = vector.broadcast %51 : vector<1x128xi1> to vector<8x128xi1>
    %53 = vector.broadcast %cst_26 : f32 to vector<8x128xf32>
    %54 = arith.select %52, %50, %53 : vector<8x128xi1>, vector<8x128xf32>
    %c16_27 = arith.constant 16 : index
    %c0_28 = arith.constant 0 : index
    %55 = vector.load %arg7[%c16_27, %c0_28] : memref<24x128xf32, #tpu.memory_space<vmem>>, vector<8x128xf32>
    tpu.vector_store %arg7[%c16_27, %c0_28], %54 {strides = array<i32>} : memref<24x128xf32, #tpu.memory_space<vmem>>, vector<8x128xf32>,
    %c0_29 = arith.constant 0 : index
    %c0_30 = arith.constant 0 : index
    %56 = vector.load %arg3[%c0_29, %c0_30] : memref<8x24xf32, #tpu.memory_space<vmem>>, vector<8x24xf32>
    %c0_31 = arith.constant 0 : index
    %c0_32 = arith.constant 0 : index
    %57 = vector.load %arg7[%c0_31, %c0_32] : memref<24x128xf32, #tpu.memory_space<vmem>>, vector<24x128xf32>
    %cst_33 = arith.constant dense<0.000000e+00> : vector<8x128xf32>
    %58 = tpu.matmul %56, %57, %cst_33 {dimension_numbers = #tpu.dot_dimension_numbers<[1], [0], [0], [1], [0, 0, 1, 1], [], []>} : vector<8x24xf32>, vector<24x128xf32>, vector<8x128xf32> -> vector<8x128xf32>
    %c0_34 = arith.constant 0 : index
    %c0_35 = arith.constant 0 : index
    %59 = vector.load %arg5[%c0_34, %c0_35] : memref<8x1xf32, #tpu.memory_space<vmem>>, vector<8x1xf32>
    %60 = vector.broadcast %59 : vector<8x1xf32> to vector<8x128xf32>
    %61 = arith.addf %58, %60 : vector<8x128xf32>
    %62 = arith.addf %61, %21 : vector<8x128xf32>
    %cst_36 = arith.constant 0.000000e+00 : f32
    %63 = vector.broadcast %cst_36 : f32 to vector<8x128xf32>
    %64 = arith.maximumf %62, %63 : vector<8x128xf32>
    %c0_37 = arith.constant 0 : index
    %c0_38 = arith.constant 0 : index
    %65 = vector.load %arg6[%c0_37, %c0_38] : memref<8x128xf32, #tpu.memory_space<vmem>>, vector<8x128xf32>
    tpu.vector_store %arg6[%c0_37, %c0_38], %64 {strides = array<i32>} : memref<8x128xf32, #tpu.memory_space<vmem>>, vector<8x128xf32>,
    return
  }
  func.func @transform_0(%arg0: i32) -> (i32, i32) {
    %c0_i32 = arith.constant 0 : i32
    %c0_i32_0 = arith.constant 0 : i32
    return %c0_i32, %arg0 : i32, i32
  }
  func.func @transform_1(%arg0: i32) -> (i32, i32) {
    %c0_i32 = arith.constant 0 : i32
    %c0_i32_0 = arith.constant 0 : i32
    %c0_i32_1 = arith.constant 0 : i32
    return %c0_i32, %c0_i32_0 : i32, i32
  }
  func.func @transform_2(%arg0: i32) -> (i32, i32) {
    %c0_i32 = arith.constant 0 : i32
    %c0_i32_0 = arith.constant 0 : i32
    %c0_i32_1 = arith.constant 0 : i32
    return %c0_i32, %c0_i32_0 : i32, i32
  }
  func.func @transform_3(%arg0: i32) -> (i32, i32) {
    %c0_i32 = arith.constant 0 : i32
    %c0_i32_0 = arith.constant 0 : i32
    %c0_i32_1 = arith.constant 0 : i32
    return %c0_i32, %c0_i32_0 : i32, i32
  }
  func.func @transform_4(%arg0: i32) -> (i32, i32) {
    %c0_i32 = arith.constant 0 : i32
    %c0_i32_0 = arith.constant 0 : i32
    %c0_i32_1 = arith.constant 0 : i32
    return %c0_i32, %c0_i32_0 : i32, i32
  }
  func.func @transform_5(%arg0: i32) -> (i32, i32) {
    %c0_i32 = arith.constant 0 : i32
    %c0_i32_0 = arith.constant 0 : i32
    return %c0_i32, %arg0 : i32, i32
  }
}

</mosaic_0001>

<bundles_post_ra>
// kernel: tpu_custom_call.1
= control target key start
LH: loop header
LB: loop body
LE: loop exit
PB: predicated region body
PF: predicated region fallthrough
CT: control target
= control target key end

     0   :  { %s319_s20 = smov 1   ;;  %v320_v1 = vmov 0.0|0.0   ;;  %vm321_vm0 = vmmov 0   ;;  %v322_v3 = vmov 0.0   ;;  %v323_v4 = vmov 0   ;;  %s404_s0 = inlined_call_operand.vmem [shape: f32[8,128], index: 0, kind: input, shape index: {}]   ;;  %s405_s1 = inlined_call_operand.vmem [shape: f32[8,24], index: 1, kind: input, shape index: {}]   ;;  %s406_s2 = inlined_call_operand.vmem [shape: f32[8,24], index: 2, kind: input, shape index: {}]   ;;  %s407_s3 = inlined_call_operand.vmem [shape: f32[8,1], index: 3, kind: input, shape index: {}]   ;;  %s408_s4 = inlined_call_operand.vmem [shape: f32[8,1], index: 4, kind: input, shape index: {}]   ;;  %s409_s5 = inlined_call_operand.hbm [shape: f32[8,128], index: 5, kind: output, shape index: {}]  }
   0x1   :  { %v37_v0 = vld [vmem:[%s404_s0] sm:$0xff]  ;;  %277 = vmatprep.subr.bf16.mxu0 %v320_v1  ;;  %265 = vmatprep.mubr.msk.f32.mxu0 %vm321_vm0, %v322_v3 }
   0x2   :  { %38 = vrot.lane.b32.xlu0 %v37_v0, %s319_s20  ;;  %v55_v2 = vld [vmem:[%s407_s3] sm:$0xff]  ;;  %293 = vset.pattern.permute.xlu1 %v323_v4 }
   0x3   :  { %10 = vsyncpa [#allocation4], 0  ;;  %58 = vperm.xlu1 %293, %v55_v2   ;;  %281 = vmatprep.subr.bf16.mxu1 %v320_v1  ;;  %s324_s0 = smov 127   ;;  %v21_v5 = vlaneseq  ;;  %vm325_vm2 = vmmov 1   ;;  %v51_v13 = vld [vmem:[%s405_s1] sm:$0xff]  ;;  %vm61_vm5 = vcmask 195584  }
   0x4   :  { %274 = vmatprep.mubr.msk.f32.mxu1 %vm321_vm0, %v322_v3  ;;  %294 = vset.pattern.permute.xlu0 %v323_v4  ;;  %v149_v19 = vld [vmem:[%s408_s4] sm:$0xff]  ;;  %s326_s4 = smov [#allocation3]  }
   0x5   :  { %v22_v6 = vand.u32 127, %v21_v5  ;;  %v145_v22 = vld [vmem:[%s406_s2] sm:$0xff]  ;;  %s237_s27 = sshll.u32 %s326_s4, 4  ;;  %s238_s27 = int_to_ptr.vmem [resolvable:$true] %s237_s27 }
   0x6   :  { %45 = vrot.lane.b32.xlu0 %v37_v0, %s324_s0  ;;  %s295_s28 = scalar_lea.vmem %s238_s27, 128  ;;  %p300_p1 = scmp.lt.s32.totalorder %s238_s27, %s238_s27 }
   0x7   :  { %v27_v7 = vand.u32 31, %v22_v6  ;;  %p296_p0 = scmp.ne.s32.totalorder %s238_s27, %s295_s28  ;;  %p301_p2 = scmp.lt.s32.totalorder %s295_s28, %s295_s28 }
   0x9   :  { %vm35_vm1 = vcmp.ne.s32.totalorder %v27_v7, 0  ;;  %vm370_vm4 = vcmp.ne.s32.totalorder %v27_v7, 31  ;;  %p302_p3 = por %p301_p2, %p300_p1 }
   0xa   :  { %vm364_vm3 = vmpackc.low %vm325_vm2, %vm35_vm1 }
   0xb   :  { %p303_p4 = pnand %p302_p3, %p296_p0 }
  0x74   :  { %v39_v8 = vpop.permute.xlu0 %38 }
  0x75   :  { %v278_v10 = vpack.c.bf16 %v37_v0, %v39_v8 }
  0x77   :  { %280 = vmatpush3.bf16.msk.msra.mxu0 %vm364_vm3, %v278_v10 }
  0x78   :  { %v46_v11 = vpop.permute.xlu0 %45  ;;  %263 = vmatprep.subr.mxu0 %v322_v3 }
  0x7b   :  { %264 = vmatpush3.msk.msra.mxu0 %vm370_vm4, %v46_v11 }
  0x7c   :  { %266 = vmatmul.mubr.msk.f32.vlgmr.msra.gmra.mrb[0].mxu0 %vm61_vm5, %v51_v13 }
  0x82   :  { %v59_v14 = vpop.permute.xlu1 %58 }
 0x14f   :  { %v131_v15 = vpop.f32.mrb[0].mxu0 }
 0x150   :  { %v132_v16 = vadd.f32 %v131_v15, %v59_v14  ;;  %v267_v17 = vpop.f32.mrb[1].mxu0 }
 0x152   :  { %v135_v18 = vmax.f32 %v132_v16, 0.0 }
 0x154   :  { %141 = vrot.lane.b32.xlu0 %v135_v18, %s324_s0  ;;  %136 = vrot.lane.b32.xlu1 %v135_v18, %s319_s20 }
 0x158   :  { %152 = vperm.xlu1 %293, %v149_v19  }
 0x1c6   :  { %v137_v20 = vpop.permute.xlu1 %136  ;;  %v142_v23 = vpop.permute.xlu0 %141 }
 0x1c7   :  { %v282_v21 = vpack.c.bf16 %v135_v18, %v137_v20 }
 0x1c9   :  { %284 = vmatpush3.bf16.msk.msra.mxu1 %vm364_vm3, %v282_v21 }
 0x1ca   :  { %272 = vmatprep.subr.mxu1 %v322_v3 }
 0x1cd   :  { %273 = vmatpush3.msk.msra.mxu1 %vm370_vm4, %v142_v23 }
 0x1ce   :  { %275 = vmatmul.mubr.msk.f32.vlgmr.msra.gmra.mrb[0].mxu1 %vm61_vm5, %v145_v22 }
 0x1d7   :  { %v153_v24 = vpop.permute.xlu1 %152 }
 0x2a1   :  { %v224_v25 = vpop.f32.mrb[0].mxu1 }
 0x2a2   :  { %v225_v26 = vadd.f32 %v224_v25, %v153_v24  ;;  %v276_v27 = vpop.f32.mrb[1].mxu1 }
 0x2a4   :  { %v228_v28 = vadd.f32 %v225_v26, %v37_v0 }
 0x2a6   :  { %v229_v29 = vmax.f32 %v228_v28, 0.0 }
 0x2a8   :  { %230 = vst [vmem:[#allocation3] sm:$0xff] %v229_v29 }
 0x2a9   :  { %306 = shalt.err (!%p303_p4)
}
 0x2aa   :  { %s307_s30 = scalar_lea.hbm %s409_s5, 128 }
 0x2ab   :  { %p308_p5 = scmp.ne.s32.totalorder %s409_s5, %s307_s30  ;;  %p311_p6 = scmp.lt.u32.totalorder %s307_s30, %s409_s5 }
 0x2ad   :  { %p313_p7 = pnand %p311_p6, %p308_p5 }
 0x2af   :  { %316 = shalt.err (!%p313_p7)
}
 0x2b0   :  { %240 = dma.vmem_to_hbm [thread:$0]  %s238_s27, 128, %s409_s5, [#allocation4]  }
 0x2b1   :  { %317 = dma.done.wait [#allocation4], 128  }
 0x2b2   :  { %318 = vsyncadd [#allocation4], 4294967168 }
 0x2b3   :  { %244 = vsyncpa [#allocation4], 1 }

</bundles_post_ra>
